<compile_context>
chip_gen: v6e
topology: v6e:2x2x1
jax: 0.10.0
libtpu: 0.0.40
codegen_flags: <defaults>
</compile_context>

<pallas_src>
import jax
import jax.numpy as jnp
from jax.experimental import pallas as pl
from jax.experimental.pallas import tpu as pltpu


def classic_attention_kernel(x_ref, u_ref, c_ref, o_ref):
    # x_ref: (nb, T, D)  block of batch rows (native dtype)
    # u_ref: (1, D)      folded projection vector  u = W^T v  (f32)
    # c_ref: (1,)        folded bias scalar        c = b . v  (SMEM, f32)
    # o_ref: (nb, T)     softmax attention weights (T on the 128-lane axis)
    x = x_ref[...].astype(jnp.float32)               # upcast in-vreg (free vs DMA)
    u = u_ref[...]                                    # (1, D)
    c = c_ref[0]                                      # scalar from SMEM

    # scores[b, t] = sum_d x[b, t, d] * u[d] + c   -> (nb, T)
    scores = jnp.sum(x * u[None, :, :], axis=-1) + c
    scores = jnp.tanh(scores)

    # Numerically stable softmax over T (last axis = lane axis).
    m = jnp.max(scores, axis=-1, keepdims=True)       # (nb, 1)
    e = jnp.exp(scores - m)                            # (nb, T)
    denom = jnp.sum(e, axis=-1, keepdims=True)         # (nb, 1)
    # Exact division: keeps rows summing to 1 (the approx EUP reciprocal was
    # the cause of the previous normalization-assert failure).
    o_ref[...] = (e / denom).astype(o_ref.dtype)


def _pick_batch_tile(B, T, D, itemsize, block_b=None):
    """Largest batch tile nb such that nb | B (no padding) and the (nb, T)
    output block is layout-legal (nb % 8 == 0 or nb == B), targeting ~2 MiB
    per x block so the DMA pipeline stays fed."""
    row_bytes = max(T * D * itemsize, 1)
    if block_b is None:
        block_b = max(1, (2 << 20) // row_bytes)
    nb = min(block_b, B)
    for n in range(nb, 0, -1):
        if B % n == 0 and (n % 8 == 0 or n == B):
            return n
    return B


def classic_attention(x, w, b, v, *, block_b=None):
    """x: (B, T, D), w: (E, D), b: (E,), v: (E,) -> softmax weights (B, T) f32."""
    x = jnp.asarray(x)                                 # keep native dtype (no f32 pass)
    B, T, D = x.shape

    # Fold v into the projection (exact in real arithmetic):
    #   tanh((x W^T + b) . v) = tanh(x (W^T v) + (b . v))
    w32 = jnp.asarray(w, jnp.float32)
    v32 = jnp.asarray(v, jnp.float32)
    b32 = jnp.asarray(b, jnp.float32)
    u = (w32.T @ v32).reshape(1, D)                    # (1, D) f32
    c = jnp.dot(b32, v32).reshape(1)                   # (1,)   f32, goes to SMEM

    itemsize = jnp.dtype(x.dtype).itemsize
    nb = _pick_batch_tile(B, T, D, itemsize, block_b)

    # VMEM budget: double-buffered x + out blocks, plus u; cap at the v7x
    # 64 MiB physical ceiling, floor at the 32 MiB default scoped limit.
    x_blk = nb * T * D * itemsize
    o_blk = nb * T * 4
    need = 2 * (x_blk + o_blk) + D * 4 + (1 << 16)
    vmem_limit = int(min(max(32 << 20, 2 * need), 64 << 20))

    cost = pl.CostEstimate(
        flops=2 * B * T * D + 6 * B * T,
        transcendentals=2 * B * T,                     # tanh + exp per element
        bytes_accessed=B * T * D * itemsize + B * T * 4 + D * 4,
    )

    out = pl.pallas_call(
        classic_attention_kernel,
        out_shape=jax.ShapeDtypeStruct((B, T), jnp.float32),
        grid=(B // nb,),
        in_specs=[
            pl.BlockSpec((nb, T, D), lambda i: (i, 0, 0)),          # x: nb rows / step
            pl.BlockSpec((1, D), lambda i: (0, 0)),                 # u: replicated (not re-DMA'd)
            pl.BlockSpec(memory_space=pltpu.MemorySpace.SMEM),      # c: scalar in SMEM
        ],
        out_specs=pl.BlockSpec((nb, T), lambda i: (i, 0)),          # T lane-dense
        compiler_params=pltpu.CompilerParams(
            dimension_semantics=("parallel",),
            vmem_limit_bytes=vmem_limit),
        cost_estimate=cost,
    )(x, u, c)

    return out                                          # (B, T)


def classic_attention_ref(x, w, b, v):
    """Pure-JAX reference mirroring the PyTorch forward (two matmuls)."""
    x = jnp.asarray(x, jnp.float32)
    lin = jnp.einsum("btd,ed->bte", x, jnp.asarray(w, jnp.float32)) + jnp.asarray(b, jnp.float32)
    scores = jnp.tanh(jnp.einsum("bte,e->bt", lin, jnp.asarray(v, jnp.float32)))
    return jax.nn.softmax(scores, axis=1)


if __name__ == "__main__":
    # Small shapes consistent with the module: batch=2, seq=8, input_dim=32, embed_dim=16.
    B, T, D, E = 2, 8, 32, 16

    key = jax.random.PRNGKey(0)
    kx, kw, kb, kv = jax.random.split(key, 4)

    x = jax.random.normal(kx, (B, T, D), dtype=jnp.float32)
    # Deterministic synthetic parameters (shapes from nn.Linear(D, E), Parameter(randn(E))).
    w = jax.random.normal(kw, (E, D), dtype=jnp.float32) * 0.1   # lin_proj.weight
    b = jax.random.normal(kb, (E,), dtype=jnp.float32) * 0.1     # lin_proj.bias
    v = jax.random.normal(kv, (E,), dtype=jnp.float32)           # self.v

    out = jax.block_until_ready(classic_attention(x, w, b, v))

    ref = classic_attention_ref(x, w, b, v)
    assert out.shape == (B, T)
    # Tolerance covers the v-folding reduction reorder vs the reference
    # two-matmul path (exact in real arithmetic, different f32 rounding).
    assert jnp.allclose(out, ref, atol=1e-3, rtol=1e-3), "mismatch vs reference"
    # Softmax rows sum to ~1 (exact division in the kernel).
    assert jnp.allclose(jnp.sum(out, axis=1), jnp.ones((B,)), atol=1e-4)

    print("KERNEL_OK")
</pallas_src>

<mosaic_0001>
module attributes {stable_mosaic.version = 11 : i64} {
  func.func @classic_attention_kernel(%arg0: i32, %arg1: memref<2x8x32xf32, #tpu.memory_space<vmem>>, %arg2: memref<1x32xf32, #tpu.memory_space<vmem>>, %arg3: memref<1xf32, #tpu.memory_space<smem>>, %arg4: memref<2x8xf32, #tpu.memory_space<vmem>>) attributes {dimension_semantics = [#tpu.dimension_semantics<parallel>], iteration_bounds = array<i64: 1>, scalar_prefetch = 0 : i64, scratch_operands = 0 : i64, tpu.core_type = #tpu.core_type<tc>, window_params = [{transform_indices = @transform_0, window_bounds = array<i64: 2, 8, 32>}, {pipeline_mode = #tpu.pipeline_mode<synchronous>, transform_indices = @transform_1, window_bounds = array<i64: 1, 32>}, {transform_indices = @transform_2, window_bounds = array<i64: 1>}, {transform_indices = @transform_3, window_bounds = array<i64: 2, 8>}]} {
    %c0 = arith.constant 0 : index
    %c0_0 = arith.constant 0 : index
    %c0_1 = arith.constant 0 : index
    %0 = vector.load %arg1[%c0, %c0_0, %c0_1] : memref<2x8x32xf32, #tpu.memory_space<vmem>>, vector<2x8x32xf32>
    %c0_2 = arith.constant 0 : index
    %c0_3 = arith.constant 0 : index
    %1 = vector.load %arg2[%c0_2, %c0_3] : memref<1x32xf32, #tpu.memory_space<vmem>>, vector<1x32xf32>
    %c0_4 = arith.constant 0 : index
    %2 = memref.load %arg3[%c0_4] : memref<1xf32, #tpu.memory_space<smem>>
    %3 = vector.shape_cast %1 : vector<1x32xf32> to vector<1x1x32xf32>
    %4 = vector.broadcast %3 : vector<1x1x32xf32> to vector<2x8x32xf32>
    %5 = arith.mulf %0, %4 : vector<2x8x32xf32>
    %cst = arith.constant dense<0.000000e+00> : vector<2x8xf32>
    %6 = vector.multi_reduction <add>, %5, %cst [2] : vector<2x8x32xf32> to vector<2x8xf32>
    %7 = vector.broadcast %2 : f32 to vector<2x8xf32>
    %8 = arith.addf %6, %7 : vector<2x8xf32>
    %9 = math.tanh %8 : vector<2x8xf32>
    %cst_5 = arith.constant dense<0xFF800000> : vector<2xf32>
    %10 = vector.multi_reduction <maximumf>, %9, %cst_5 [1] : vector<2x8xf32> to vector<2xf32>
    %11 = vector.shape_cast %10 : vector<2xf32> to vector<2x1xf32>
    %12 = vector.broadcast %11 : vector<2x1xf32> to vector<2x8xf32>
    %13 = arith.subf %9, %12 : vector<2x8xf32>
    %14 = math.exp %13 : vector<2x8xf32>
    %cst_6 = arith.constant dense<0.000000e+00> : vector<2xf32>
    %15 = vector.multi_reduction <add>, %14, %cst_6 [1] : vector<2x8xf32> to vector<2xf32>
    %16 = vector.shape_cast %15 : vector<2xf32> to vector<2x1xf32>
    %17 = vector.broadcast %16 : vector<2x1xf32> to vector<2x8xf32>
    %18 = arith.divf %14, %17 : vector<2x8xf32>
    %c0_7 = arith.constant 0 : index
    %c0_8 = arith.constant 0 : index
    %19 = vector.load %arg4[%c0_7, %c0_8] : memref<2x8xf32, #tpu.memory_space<vmem>>, vector<2x8xf32>
    tpu.vector_store %arg4[%c0_7, %c0_8], %18 {strides = array<i32>} : memref<2x8xf32, #tpu.memory_space<vmem>>, vector<2x8xf32>,
    return
  }
  func.func @transform_0(%arg0: i32) -> (i32, i32, i32) {
    %c0_i32 = arith.constant 0 : i32
    %c0_i32_0 = arith.constant 0 : i32
    %c0_i32_1 = arith.constant 0 : i32
    return %arg0, %c0_i32, %c0_i32_0 : i32, i32, i32
  }
  func.func @transform_1(%arg0: i32) -> (i32, i32) {
    %c0_i32 = arith.constant 0 : i32
    %c0_i32_0 = arith.constant 0 : i32
    %c0_i32_1 = arith.constant 0 : i32
    return %c0_i32, %c0_i32_0 : i32, i32
  }
  func.func @transform_2(%arg0: i32) -> i32 {
    %c0_i32 = arith.constant 0 : i32
    %c0_i32_0 = arith.constant 0 : i32
    return %c0_i32 : i32
  }
  func.func @transform_3(%arg0: i32) -> (i32, i32) {
    %c0_i32 = arith.constant 0 : i32
    %c0_i32_0 = arith.constant 0 : i32
    return %arg0, %c0_i32 : i32, i32
  }
}

</mosaic_0001>

<bundles_post_ra>
// kernel: tpu_custom_call.1
= control target key start
LH: loop header
LB: loop body
LE: loop exit
PB: predicated region body
PF: predicated region fallthrough
CT: control target
= control target key end

     0   :  { %9 = vsyncpa [#allocation4], 0  ;;  %s267_s0 = inlined_call_operand.hbm [shape: f32[2,8,32], index: 0, kind: input, shape index: {}]   ;;  %s268_s1 = inlined_call_operand.vmem [shape: f32[1,32], index: 1, kind: input, shape index: {}]   ;;  %s269_s2 = inlined_call_operand.<no memory space> [shape: f32[1], index: 2, kind: input, shape index: {}]   ;;  %s270_s3 = inlined_call_operand.hbm [shape: f32[2,8], index: 3, kind: output, shape index: {}]  }
   0x1   :  { %10 = vsyncpa [#allocation5], 0  ;;  %s224_s12 = smov [#allocation3]  }
   0x2   :  { %s16_s13 = sshll.u32 %s224_s12, 4  ;;  %s17_s13 = int_to_ptr.vmem [resolvable:$true] %s16_s13 }
   0x3   :  { %s188_s14 = scalar_lea.vmem %s17_s13, 256  ;;  %p193_p1 = scmp.lt.s32.totalorder %s17_s13, %s17_s13 }
   0x4   :  { %p189_p0 = scmp.ne.s32.totalorder %s17_s13, %s188_s14  ;;  %p194_p2 = scmp.lt.s32.totalorder %s188_s14, %s188_s14 }
   0x6   :  { %p195_p3 = por %p194_p2, %p193_p1 }
   0x8   :  { %p196_p4 = pnand %p195_p3, %p189_p0 }
   0xa   :  { %199 = shalt.err (!%p196_p4)
}
   0xb   :  { %s225_s15 = smov 128   ;;  %s226_s16 = smov 8  }
   0xc   :  { %22 = dma.hbm_to_vmem [thread:$0]  %s267_s0, 256, %s17_s13, [#allocation4], %s225_s15, %s225_s15, %s226_s16  }
   0xd   :  { %220 = dma.done.wait [#allocation4], 256  }
   0xe   :  { %221 = vsyncadd [#allocation4], 4294967040  ;;  %v30_v0 = vld [vmem:[#allocation3] sm:$0xff]  ;;  %vm42_vm0 = vcmask 261120   ;;  %v31_v2 = vld [vmem:[#allocation3 + $0x8] sm:$0xff]  ;;  %v49_v7 = vstv %s269_s2  ;;  %v56_v12 = vlaneseq  ;;  %vm66_vm1 = vcmask 1041409  }
   0xf   :  { %v160_v1 = vld [vmem:[%s268_s1] ss:$0 sm:$0xff]  ;;  %vm69_vm2 = vcmask 58368   ;;  %v227_v22 = vmov 0   ;;  %s228_s0 = smov [#allocation6]  }
  0x10   :  { %v40_v3 = vmul.f32 %v160_v1, %v30_v0  ;;  %v41_v4 = vmul.f32 %v160_v1, %v31_v2  ;;  %v57_v13 = vand.u32 127, %v56_v12  ;;  %v59_v14 = vshrl.u32 %v56_v12, 7  ;;  %167 = vset.pattern.permute.xlu0 %v227_v22  ;;  %166 = vset.pattern.permute.xlu1 %v227_v22  ;;  %s151_s1 = sshll.u32 %s228_s0, 4  ;;  %s152_s1 = int_to_ptr.vmem [resolvable:$true] %s151_s1 }
  0x11   :  { %s200_s2 = scalar_lea.vmem %s152_s1, 32  ;;  %p205_p6 = scmp.lt.s32.totalorder %s152_s1, %s152_s1 }
  0x12   :  { %v43_v5 = vsel %vm42_vm0, %v40_v3, 0.0  ;;  %v46_v6 = vsel %vm42_vm0, %v41_v4, 0.0  ;;  %v60_v15 = vsub.s32 %v57_v13, %v59_v14  ;;  %v76_v23 = vsub.s32 0, %v59_v14  ;;  %p201_p5 = scmp.ne.s32.totalorder %s152_s1, %s200_s2  ;;  %p206_p7 = scmp.lt.s32.totalorder %s200_s2, %s200_s2 }
  0x13   :  { %44 = vadd.xlane.f32.xlu0 %v43_v5  ;;  %v80_v24 = vsub.s32 1, %v59_v14 }
  0x14   :  { %p207_p8 = por %p206_p7, %p205_p6 }
  0x16   :  { %p208_p9 = pnand %p207_p8, %p201_p5 }
  0x17   :  { %47 = vadd.xlane.f32.xlu0 %v46_v6 }
  0x9c   :  { %v45_v8 = vpop.xlane.xlu0 %44 }
  0x9d   :  { %v50_v9 = vadd.f32 %v49_v7, %v45_v8 }
  0x9f   :  { %168 = vtanh.f32 %v50_v9 }
  0xa0   :  { %v48_v10 = vpop.xlane.xlu0 %47 }
  0xa1   :  { %v51_v11 = vadd.f32 %v49_v7, %v48_v10 }
  0xa3   :  { %170 = vtanh.f32 %v51_v11 }
  0xac   :  { %v169_v16 = vpop.eup %168 }
  0xad   :  { %v61_v18 = vrot.slane %v169_v16, %v60_v15 }
  0xb0   :  { %v171_v17 = vpop.eup %170 }
  0xb1   :  { %v65_v19 = vrot.slane %v171_v17, %v60_v15 }
  0xb3   :  { %v67_v20 = vsel %vm66_vm1, %v65_v19, %v61_v18 }
  0xb4   :  { %v70_v21 = vsel %vm69_vm2, %v67_v20, -inf }
  0xb5   :  { %71 = vmax.xlane.f32.xlu1 %v70_v21 }
 0x13e   :  { %v72_v25 = vpop.xlane.xlu1 %71 }
 0x13f   :  { %v77_v26 = vrot.slane %v72_v25, %v76_v23  ;;  %v81_v27 = vrot.slane %v72_v25, %v80_v24 }
 0x141   :  { %v84_v28 = vsub.f32 %v169_v16, %v77_v26  ;;  %v85_v29 = vsub.f32 %v171_v17, %v81_v27 }
 0x143   :  { %v86_v30 = vmul.f32 1.442695, %v84_v28  ;;  %v88_v31 = vmul.f32 1.442695, %v85_v29 }
 0x145   :  { %172 = vpow2.f32 %v86_v30 }
 0x146   :  { %174 = vpow2.f32 %v88_v31 }
 0x152   :  { %v173_v32 = vpop.eup %172 }
 0x153   :  { %v175_v33 = vpop.eup %174  ;;  %93 = vperm.xlu1 %166, %v173_v32  }
 0x154   :  { %96 = vperm.xlu0 %167, %v175_v33  }
 0x1ce   :  { %v94_v34 = vpop.permute.xlu1 %93 }
 0x1cf   :  { %v97_v35 = vpop.permute.xlu0 %96  ;;  %v101_v36 = vrot.slane %v94_v34, %v60_v15 }
 0x1d0   :  { %v105_v37 = vrot.slane %v97_v35, %v60_v15 }
 0x1d2   :  { %v106_v38 = vsel %vm66_vm1, %v105_v37, %v101_v36 }
 0x1d3   :  { %v108_v39 = vsel %vm69_vm2, %v106_v38, 0.0 }
 0x1d4   :  { %109 = vadd.xlane.f32.xlu1 %v108_v39 }
 0x25d   :  { %v110_v40 = vpop.xlane.xlu1 %109 }
 0x25e   :  { %v115_v41 = vrot.slane %v110_v40, %v76_v23  ;;  %v119_v42 = vrot.slane %v110_v40, %v80_v24 }
 0x260   :  { %176 = vrcp.f32 %v115_v41 }
 0x261   :  { %178 = vrcp.f32 %v119_v42 }
 0x26d   :  { %v177_v43 = vpop.eup %176 }
 0x26e   :  { %v123_v44 = vmul.f32 %v177_v43, %v173_v32  ;;  %v179_v45 = vpop.eup %178 }
 0x26f   :  { %v125_v46 = vmul.f32 %v179_v45, %v175_v33 }
 0x270   :  { %129 = vperm.xlu0 %167, %v123_v44  }
 0x274   :  { %132 = vperm.xlu0 %167, %v125_v46  }
 0x2eb   :  { %v130_v47 = vpop.permute.xlu0 %129 }
 0x2ec   :  { %v137_v49 = vrot.slane %v130_v47, %v60_v15 }
 0x2ef   :  { %v133_v48 = vpop.permute.xlu0 %132 }
 0x2f0   :  { %v141_v50 = vrot.slane %v133_v48, %v60_v15 }
 0x2f2   :  { %v142_v51 = vsel %vm66_vm1, %v141_v50, %v137_v49 }
 0x2f3   :  { %144 = vst.msk [vmem:[#allocation6] sm:$0x3] %vm69_vm2, %v142_v51 }
 0x2f4   :  { %211 = shalt.err (!%p208_p9)
}
 0x2f5   :  { %154 = dma.vmem_to_hbm [thread:$0]  %s152_s1, 32, %s270_s3, [#allocation5]  }
 0x2f6   :  { %222 = dma.done.wait [#allocation5], 32  }
 0x2f7   :  { %223 = vsyncadd [#allocation5], 4294967264 }
 0x2f8   :  { %158 = vsyncpa [#allocation4], 1 }
 0x2f9   :  { %159 = vsyncpa [#allocation5], 1 }

</bundles_post_ra>
